<compile_context>
chip_gen: v7x
topology: tpu7x:2x2x1
jax: 0.10.0
libtpu: 0.0.40
codegen_flags: <defaults>
</compile_context>

<pallas_src>
from functools import partial

import jax
import jax.numpy as jnp
from jax.experimental import pallas as pl
from jax.experimental.pallas import tpu as pltpu

INPUT_SIZE = 10
HIDDEN_SIZE = 32
OUTPUT_SIZE = 69
_SUBLANE = 8
_DEFAULT_BLOCK_B = 8192   # <= 8192 keeps double-buffered tiles well inside VMEM on v5e/v6e/v7x


def _round_up(n, m):
    return pl.cdiv(n, m) * m


def mlp_kernel(x_ref, w1_ref, b1_ref, w2_ref, b2_ref, o_ref):
    x = x_ref[...]                                              # (tb, 10)
    h = jnp.dot(x, w1_ref[...],
                preferred_element_type=jnp.float32)             # (tb, 32) f32 acc
    h = jnp.maximum(h + b1_ref[...], 0.0)                       # bias + ReLU epilogue
    out = jnp.dot(h.astype(w2_ref.dtype), w2_ref[...],
                  preferred_element_type=jnp.float32)           # (tb, 69) f32 acc
    o_ref[...] = (out + b2_ref[...]).astype(o_ref.dtype)


@partial(jax.jit, static_argnames=("block_b",))
def simple_linear_model(x, w1, b1, w2, b2, *, block_b=_DEFAULT_BLOCK_B):
    """x: (B, INPUT_SIZE) f32 -> (B, OUTPUT_SIZE) f32.

    block_b: max batch rows per grid step (rounded up to a multiple of 8).
    """
    B = x.shape[0]

    if B <= block_b:
        tb = B                                   # single block == full dim (always legal)
    else:
        tb = _round_up(block_b, _SUBLANE)        # multi-block: sublane-aligned tile
    grid = (pl.cdiv(B, tb),)                     # last block may be partial -> masked

    b1r = b1.reshape(1, HIDDEN_SIZE)
    b2r = b2.reshape(1, OUTPUT_SIZE)

    flops = 2 * B * (INPUT_SIZE * HIDDEN_SIZE + HIDDEN_SIZE * OUTPUT_SIZE)
    weight_bytes = 4 * (INPUT_SIZE * HIDDEN_SIZE + HIDDEN_SIZE
                        + HIDDEN_SIZE * OUTPUT_SIZE + OUTPUT_SIZE)
    bytes_accessed = B * 4 * (INPUT_SIZE + OUTPUT_SIZE) + weight_bytes

    return pl.pallas_call(
        mlp_kernel,
        out_shape=jax.ShapeDtypeStruct((B, OUTPUT_SIZE), jnp.float32),
        grid=grid,
        in_specs=[
            pl.BlockSpec((tb, INPUT_SIZE), lambda i: (i, 0)),           # x: batch-tiled
            pl.BlockSpec((INPUT_SIZE, HIDDEN_SIZE), lambda i: (0, 0)),  # w1: resident
            pl.BlockSpec((1, HIDDEN_SIZE), lambda i: (0, 0)),           # b1: resident
            pl.BlockSpec((HIDDEN_SIZE, OUTPUT_SIZE), lambda i: (0, 0)), # w2: resident
            pl.BlockSpec((1, OUTPUT_SIZE), lambda i: (0, 0)),           # b2: resident
        ],
        out_specs=pl.BlockSpec((tb, OUTPUT_SIZE), lambda i: (i, 0)),
        compiler_params=pltpu.CompilerParams(
            dimension_semantics=("parallel",)),                          # v7x: 2 TCs
        cost_estimate=pl.CostEstimate(
            flops=flops, transcendentals=0, bytes_accessed=bytes_accessed),
    )(x, w1, b1r, w2, b2r)


def init_params(key):
    """Deterministic init mimicking nn.Linear: U(-1/sqrt(fan_in), 1/sqrt(fan_in))."""
    k1, k2, k3, k4 = jax.random.split(key, 4)
    lim1 = 1.0 / jnp.sqrt(INPUT_SIZE)
    lim2 = 1.0 / jnp.sqrt(HIDDEN_SIZE)
    w1 = jax.random.uniform(k1, (INPUT_SIZE, HIDDEN_SIZE), jnp.float32, -lim1, lim1)
    b1 = jax.random.uniform(k2, (HIDDEN_SIZE,), jnp.float32, -lim1, lim1)
    w2 = jax.random.uniform(k3, (HIDDEN_SIZE, OUTPUT_SIZE), jnp.float32, -lim2, lim2)
    b2 = jax.random.uniform(k4, (OUTPUT_SIZE,), jnp.float32, -lim2, lim2)
    return w1, b1, w2, b2


if __name__ == "__main__":
    key = jax.random.PRNGKey(0)
    k_x, k_p, k_x2 = jax.random.split(key, 3)
    w1, b1, w2, b2 = init_params(k_p)

    # Small case from the module spec (batch=2): single block, no padding/slicing.
    x = jax.random.normal(k_x, (2, INPUT_SIZE), jnp.float32)
    ref = jnp.maximum(x @ w1 + b1, 0.0) @ w2 + b2
    out = jax.block_until_ready(simple_linear_model(x, w1, b1, w2, b2))
    assert out.shape == (2, OUTPUT_SIZE)
    assert jnp.allclose(out, ref, atol=1e-5, rtol=1e-5)

    # Multi-block path with a partial (masked) last block: B=300, tb=128 -> grid=3.
    xb = jax.random.normal(k_x2, (300, INPUT_SIZE), jnp.float32)
    refb = jnp.maximum(xb @ w1 + b1, 0.0) @ w2 + b2
    outb = jax.block_until_ready(
        simple_linear_model(xb, w1, b1, w2, b2, block_b=128))
    assert outb.shape == (300, OUTPUT_SIZE)
    assert jnp.allclose(outb, refb, atol=1e-5, rtol=1e-5)

    # Default-tile path (single 300-row block).
    outd = jax.block_until_ready(simple_linear_model(xb, w1, b1, w2, b2))
    assert jnp.allclose(outd, refb, atol=1e-5, rtol=1e-5)

    print("KERNEL_OK")
</pallas_src>

<mosaic_0001>
module attributes {stable_mosaic.version = 11 : i64} {
  func.func @mlp_kernel(%arg0: i32, %arg1: memref<2x10xf32, #tpu.memory_space<vmem>>, %arg2: memref<10x32xf32, #tpu.memory_space<vmem>>, %arg3: memref<1x32xf32, #tpu.memory_space<vmem>>, %arg4: memref<32x69xf32, #tpu.memory_space<vmem>>, %arg5: memref<1x69xf32, #tpu.memory_space<vmem>>, %arg6: memref<2x69xf32, #tpu.memory_space<vmem>>) attributes {dimension_semantics = [#tpu.dimension_semantics<parallel>], iteration_bounds = array<i64: 1>, scalar_prefetch = 0 : i64, scratch_operands = 0 : i64, tpu.core_type = #tpu.core_type<tc>, window_params = [{transform_indices = @transform_0, window_bounds = array<i64: 2, 10>}, {pipeline_mode = #tpu.pipeline_mode<synchronous>, transform_indices = @transform_1, window_bounds = array<i64: 10, 32>}, {pipeline_mode = #tpu.pipeline_mode<synchronous>, transform_indices = @transform_2, window_bounds = array<i64: 1, 32>}, {pipeline_mode = #tpu.pipeline_mode<synchronous>, transform_indices = @transform_3, window_bounds = array<i64: 32, 69>}, {pipeline_mode = #tpu.pipeline_mode<synchronous>, transform_indices = @transform_4, window_bounds = array<i64: 1, 69>}, {transform_indices = @transform_5, window_bounds = array<i64: 2, 69>}]} {
    %c0 = arith.constant 0 : index
    %c0_0 = arith.constant 0 : index
    %0 = vector.load %arg1[%c0, %c0_0] : memref<2x10xf32, #tpu.memory_space<vmem>>, vector<2x10xf32>
    %c0_1 = arith.constant 0 : index
    %c0_2 = arith.constant 0 : index
    %1 = vector.load %arg2[%c0_1, %c0_2] : memref<10x32xf32, #tpu.memory_space<vmem>>, vector<10x32xf32>
    %cst = arith.constant dense<0.000000e+00> : vector<2x32xf32>
    %2 = tpu.matmul %0, %1, %cst {dimension_numbers = #tpu.dot_dimension_numbers<[1], [0], [0], [1], [0, 0, 1, 1], [], []>} : vector<2x10xf32>, vector<10x32xf32>, vector<2x32xf32> -> vector<2x32xf32>
    %c0_3 = arith.constant 0 : index
    %c0_4 = arith.constant 0 : index
    %3 = vector.load %arg3[%c0_3, %c0_4] : memref<1x32xf32, #tpu.memory_space<vmem>>, vector<1x32xf32>
    %4 = vector.broadcast %3 : vector<1x32xf32> to vector<2x32xf32>
    %5 = arith.addf %2, %4 : vector<2x32xf32>
    %cst_5 = arith.constant 0.000000e+00 : f32
    %6 = vector.broadcast %cst_5 : f32 to vector<2x32xf32>
    %7 = arith.maximumf %5, %6 : vector<2x32xf32>
    %c0_6 = arith.constant 0 : index
    %c0_7 = arith.constant 0 : index
    %8 = vector.load %arg4[%c0_6, %c0_7] : memref<32x69xf32, #tpu.memory_space<vmem>>, vector<32x69xf32>
    %cst_8 = arith.constant dense<0.000000e+00> : vector<2x69xf32>
    %9 = tpu.matmul %7, %8, %cst_8 {dimension_numbers = #tpu.dot_dimension_numbers<[1], [0], [0], [1], [0, 0, 1, 1], [], []>} : vector<2x32xf32>, vector<32x69xf32>, vector<2x69xf32> -> vector<2x69xf32>
    %c0_9 = arith.constant 0 : index
    %c0_10 = arith.constant 0 : index
    %10 = vector.load %arg5[%c0_9, %c0_10] : memref<1x69xf32, #tpu.memory_space<vmem>>, vector<1x69xf32>
    %11 = vector.broadcast %10 : vector<1x69xf32> to vector<2x69xf32>
    %12 = arith.addf %9, %11 : vector<2x69xf32>
    %c0_11 = arith.constant 0 : index
    %c0_12 = arith.constant 0 : index
    %13 = vector.load %arg6[%c0_11, %c0_12] : memref<2x69xf32, #tpu.memory_space<vmem>>, vector<2x69xf32>
    tpu.vector_store %arg6[%c0_11, %c0_12], %12 {strides = array<i32>} : memref<2x69xf32, #tpu.memory_space<vmem>>, vector<2x69xf32>,
    return
  }
  func.func @transform_0(%arg0: i32) -> (i32, i32) {
    %c0_i32 = arith.constant 0 : i32
    %c0_i32_0 = arith.constant 0 : i32
    return %arg0, %c0_i32 : i32, i32
  }
  func.func @transform_1(%arg0: i32) -> (i32, i32) {
    %c0_i32 = arith.constant 0 : i32
    %c0_i32_0 = arith.constant 0 : i32
    %c0_i32_1 = arith.constant 0 : i32
    return %c0_i32, %c0_i32_0 : i32, i32
  }
  func.func @transform_2(%arg0: i32) -> (i32, i32) {
    %c0_i32 = arith.constant 0 : i32
    %c0_i32_0 = arith.constant 0 : i32
    %c0_i32_1 = arith.constant 0 : i32
    return %c0_i32, %c0_i32_0 : i32, i32
  }
  func.func @transform_3(%arg0: i32) -> (i32, i32) {
    %c0_i32 = arith.constant 0 : i32
    %c0_i32_0 = arith.constant 0 : i32
    %c0_i32_1 = arith.constant 0 : i32
    return %c0_i32, %c0_i32_0 : i32, i32
  }
  func.func @transform_4(%arg0: i32) -> (i32, i32) {
    %c0_i32 = arith.constant 0 : i32
    %c0_i32_0 = arith.constant 0 : i32
    %c0_i32_1 = arith.constant 0 : i32
    return %c0_i32, %c0_i32_0 : i32, i32
  }
  func.func @transform_5(%arg0: i32) -> (i32, i32) {
    %c0_i32 = arith.constant 0 : i32
    %c0_i32_0 = arith.constant 0 : i32
    return %arg0, %c0_i32 : i32, i32
  }
}

</mosaic_0001>

<bundles_post_ra>
// kernel: simple_linear_model.1
= control target key start
LH: loop header
LB: loop body
LE: loop exit
PB: predicated region body
PF: predicated region fallthrough
CT: control target
= control target key end

     0   :  { %10 = vsyncpa [#allocation3], 0  ;;  %s447_s0 = inlined_call_operand.vmem [shape: f32[2,10], index: 0, kind: input, shape index: {}]   ;;  %s448_s1 = inlined_call_operand.hbm [shape: f32[10,32], index: 1, kind: input, shape index: {}]   ;;  %s449_s2 = inlined_call_operand.vmem [shape: f32[1,32], index: 2, kind: input, shape index: {}]   ;;  %s450_s3 = inlined_call_operand.hbm [shape: f32[32,69], index: 3, kind: input, shape index: {}]   ;;  %s451_s4 = inlined_call_operand.vmem [shape: f32[1,69], index: 4, kind: input, shape index: {}]   ;;  %s452_s5 = inlined_call_operand.hbm [shape: f32[2,69], index: 5, kind: output, shape index: {}]  }
   0x1   :  { %11 = vsyncpa [#allocation6], 0 }
   0x2   :  { %12 = vsyncpa [#allocation4], 0  ;;  %s363_s18 = smov [#allocation2]   ;;  %s291_s22 = scalar_lea.hbm %s448_s1, 256 }
   0x3   :  { %s20_s19 = sshll.u32 %s363_s18, 4  ;;  %p292_p0 = scmp.ne.s32.totalorder %s448_s1, %s291_s22  ;;  %s21_s19 = int_to_ptr.vmem [resolvable:$true] %s20_s19 }
   0x4   :  { %p295_p1 = scmp.lt.u32.totalorder %s291_s22, %s448_s1 }
   0x6   :  { %p297_p2 = pnand %p295_p1, %p292_p0 }
   0x8   :  { %300 = shalt.err (!%p297_p2)
}
   0x9   :  { %s301_s27 = scalar_lea.vmem %s21_s19, 256  ;;  %p306_p4 = scmp.lt.s32.totalorder %s21_s19, %s21_s19 }
   0xa   :  { %p302_p3 = scmp.ne.s32.totalorder %s21_s19, %s301_s27  ;;  %p307_p5 = scmp.lt.s32.totalorder %s301_s27, %s301_s27 }
   0xc   :  { %p308_p6 = por %p307_p5, %p306_p4 }
   0xe   :  { %p309_p7 = pnand %p308_p6, %p302_p3 }
  0x10   :  { %312 = shalt.err (!%p309_p7)
}
  0x11   :  { %s364_s28 = smov 128   ;;  %s365_s29 = smov 8  }
  0x12   :  { %26 = dma.hbm_to_vmem [thread:$0]  %s448_s1, 256, %s21_s19, [#allocation3], %s364_s28, %s364_s28, %s365_s29  }
  0x13   :  { %s366_s7 = smov [#allocation5]   ;;  %s313_s11 = scalar_lea.hbm %s450_s3, 512 }
  0x14   :  { %s34_s8 = sshll.u32 %s366_s7, 4  ;;  %p314_p8 = scmp.ne.s32.totalorder %s450_s3, %s313_s11  ;;  %s35_s8 = int_to_ptr.vmem [resolvable:$true] %s34_s8 }
  0x15   :  { %p317_p9 = scmp.lt.u32.totalorder %s313_s11, %s450_s3 }
  0x17   :  { %p319_p10 = pnand %p317_p9, %p314_p8 }
  0x19   :  { %322 = shalt.err (!%p319_p10)
}
  0x1a   :  { %s323_s16 = scalar_lea.vmem %s35_s8, 512  ;;  %p328_p12 = scmp.lt.s32.totalorder %s35_s8, %s35_s8 }
  0x1b   :  { %p324_p11 = scmp.ne.s32.totalorder %s35_s8, %s323_s16  ;;  %p329_p13 = scmp.lt.s32.totalorder %s323_s16, %s323_s16 }
  0x1d   :  { %p330_p0 = por %p329_p13, %p328_p12 }
  0x1f   :  { %p331_p1 = pnand %p330_p0, %p324_p11 }
  0x21   :  { %334 = shalt.err (!%p331_p1)
}
  0x22   :  { %40 = dma.hbm_to_vmem [thread:$0]  %s450_s3, 512, %s35_s8, [#allocation6], %s364_s28, %s364_s28, %s365_s29  }
  0x23   :  { %357 = dma.done.wait [#allocation3], 256  }
  0x24   :  { %358 = vsyncadd [#allocation3], 4294967040 }
  0x25   :  { %359 = dma.done.wait [#allocation6], 512  }
  0x26   :  { %360 = vsyncadd [#allocation6], 4294966784  ;;  %v367_v0 = vmov 0.0|0.0   ;;  %vm368_vm0 = vmmov 0   ;;  %v369_v1 = vmov 0.0   ;;  %vm63_vm1 = vcmask 1041408  }
  0x27   :  { %272 = vmatprep.subr.bf16.mxu0 %v367_v0  ;;  %276 = vmatprep.subr.bf16.mxu1 %v367_v0  ;;  %v50_v2 = vld [vmem:[#allocation2] sm:$0xff]  ;;  %v51_v3 = vld [vmem:[#allocation2 + $0x8] sm:$0x3]  ;;  %vm370_vm2 = vmmov 1   ;;  %v138_v5 = vld [vmem:[#allocation5] sm:$0xff]  ;;  %vm59_vm4 = vcmask 80896  }
  0x28   :  { %258 = vmatprep.mubr.msk.f32.mxu0 %vm368_vm0, %v369_v1  ;;  %269 = vmatprep.mubr.msk.f32.mxu1 %vm368_vm0, %v369_v1  ;;  %vm274_vm3 = vmpackc.low %vm63_vm1, %vm370_vm2  ;;  %v273_v4 = vpack.c.bf16 %v51_v3, %v50_v2  ;;  %v139_v6 = vld [vmem:[#allocation5 + $0x8] sm:$0xff]  ;;  %v49_v8 = vld [vmem:[%s447_s0] sm:$0x3]  ;;  %vm149_vm5 = vcmask 261120   ;;  %s371_s22 = smov [#allocation7]   ;;  %vm223_vm6 = vcmask 558080  }
  0x29   :  { %v277_v7 = vpack.c.bf16 %v139_v6, %v138_v5  ;;  %v140_v9 = vld [vmem:[#allocation5 + $0x10] sm:$0xff]  ;;  %v141_v10 = vld [vmem:[#allocation5 + $0x18] sm:$0xff]  ;;  %s231_s23 = sshll.u32 %s371_s22, 4  ;;  %s232_s23 = int_to_ptr.vmem [resolvable:$true] %s231_s23 }
  0x2a   :  { %275 = vmatpush3.bf16.msk.msra.mxu0 %vm274_vm3, %v273_v4  ;;  %v280_v11 = vpack.c.bf16 %v141_v10, %v140_v9  ;;  %v241_v12 = vld [vmem:[%s449_s2] ss:$0 sm:$0xff]  ;;  %s335_s24 = scalar_lea.vmem %s232_s23, 32  ;;  %p340_p3 = scmp.lt.s32.totalorder %s232_s23, %s232_s23 }
  0x2b   :  { %278 = vmatpush3.bf16.msra.mxu1 %v277_v7  ;;  %v244_v17 = vld [vmem:[%s451_s4] ss:$0 sm:$0xff]  ;;  %p336_p2 = scmp.ne.s32.totalorder %s232_s23, %s335_s24  ;;  %p341_p4 = scmp.lt.s32.totalorder %s335_s24, %s335_s24 }
  0x2c   :  { %279 = vmatprep.subr.bf16.mxu1 %v367_v0 }
  0x2d   :  { %259 = vmatmul.mubr.msk.f32.vlgmr.msra.gmra.mrb[0].mxu0 %vm59_vm4, %v49_v8  ;;  %p342_p5 = por %p341_p4, %p340_p3 }
  0x2f   :  { %281 = vmatpush3.bf16.msra.mxu1 %v280_v11  ;;  %p343_p6 = pnand %p342_p5, %p336_p2 }
 0x100   :  { %v133_v13 = vpop.f32.mrb[0].mxu0 }
 0x101   :  { %v134_v14 = vadd.f32 %v241_v12, %v133_v13  ;;  %v260_v15 = vpop.f32.mrb[1].mxu0 }
 0x103   :  { %v137_v16 = vmax.f32 %v134_v14, 0.0 }
 0x105   :  { %270 = vmatmul.mubr.msk.f32.vlgmr.msra.gmra.mrb[0].mxu1 %vm149_vm5, %v137_v16 }
 0x1d8   :  { %v219_v18 = vpop.f32.mrb[0].mxu1 }
 0x1d9   :  { %v220_v19 = vadd.f32 %v244_v17, %v219_v18  ;;  %v271_v20 = vpop.f32.mrb[1].mxu1 }
 0x1db   :  { %224 = vst.msk [vmem:[#allocation7] sm:$0x3] %vm223_vm6, %v220_v19 }
 0x1dc   :  { %346 = shalt.err (!%p343_p6)
}
 0x1dd   :  { %s347_s26 = scalar_lea.hbm %s452_s5, 32 }
 0x1de   :  { %p348_p7 = scmp.ne.s32.totalorder %s452_s5, %s347_s26  ;;  %p351_p8 = scmp.lt.u32.totalorder %s347_s26, %s452_s5 }
 0x1e0   :  { %p353_p9 = pnand %p351_p8, %p348_p7 }
 0x1e2   :  { %356 = shalt.err (!%p353_p9)
}
 0x1e3   :  { %234 = dma.vmem_to_hbm [thread:$0]  %s232_s23, 32, %s452_s5, [#allocation4]  }
 0x1e4   :  { %361 = dma.done.wait [#allocation4], 32  }
 0x1e5   :  { %362 = vsyncadd [#allocation4], 4294967264 }
 0x1e6   :  { %238 = vsyncpa [#allocation3], 1 }
 0x1e7   :  { %239 = vsyncpa [#allocation6], 1 }
 0x1e8   :  { %240 = vsyncpa [#allocation4], 1 }

</bundles_post_ra>
